<compile_context>
chip_gen: v7x
topology: tpu7x:2x2x1
jax: 0.10.0
libtpu: 0.0.40
codegen_flags: <defaults>
</compile_context>

<pallas_src>
import functools

import jax
import jax.numpy as jnp
from jax.experimental import pallas as pl
from jax.experimental.pallas import tpu as pltpu


def _label_smoothing_kernel(n_ref, x_ref, t_ref, o_ref, *, confidence, smoothing):
    # n_ref : SMEM (1,) int32   -- number of valid rows (ragged-last-block mask)
    # x_ref : (TM, C)           -- logits block, native dtype
    # t_ref : (TM, 1) int32     -- target class per row
    # o_ref : (1, 8, 128) f32   -- this block's partial loss sum (lane-dense slab)
    i = pl.program_id(0)

    x = x_ref[...].astype(jnp.float32)                        # (TM, C)
    tm, c = x.shape

    # Numerically stable log-softmax pieces, computed once and reused.
    m = jnp.max(x, axis=-1, keepdims=True)                    # (TM, 1)  XLU reduce
    shifted = x - m                                           # (TM, C)  VPU
    lse = jnp.log(jnp.sum(jnp.exp(shifted), axis=-1,          # (TM, 1)  EUP + XLU
                          keepdims=True))
    # logprobs = shifted - lse  (never materialized explicitly)

    # Target log-prob via one-hot compare + masked sum (no data-dependent gather).
    col = jax.lax.broadcasted_iota(jnp.int32, (tm, c), 1)     # (TM, C)
    onehot = col == t_ref[...]                                # (TM, C) bool
    x_t = jnp.sum(jnp.where(onehot, shifted, 0.0),
                  axis=-1, keepdims=True)                     # (TM, 1)
    nll_loss = lse - x_t                                      # = -logprobs[target]

    if smoothing != 0.0:                                      # trace-time specialization
        smooth_loss = lse - jnp.mean(shifted, axis=-1, keepdims=True)
        row_loss = confidence * nll_loss + smoothing * smooth_loss
    else:                                                     # confidence == 1.0
        row_loss = nll_loss

    # Mask rows past n_valid (ragged last block may hold garbage, even NaN):
    # must stay a select, never a multiply.
    n_valid = n_ref[0]
    row_idx = i * tm + jax.lax.broadcasted_iota(jnp.int32, (tm, 1), 0)
    row_loss = jnp.where(row_idx < n_valid, row_loss, 0.0)

    block_sum = jnp.sum(row_loss)
    o_ref[...] = jnp.full(o_ref.shape, block_sum, dtype=jnp.float32)


def _round_up(a, b):
    return ((a + b - 1) // b) * b


def label_smoothing_forward(x, target, smoothing=0.0, block_budget_bytes=16 << 20):
    """Pallas implementation of LabelSmoothing.forward(x, target).

    x:      (N, C) logits (any float dtype; streamed in native dtype)
    target: (N,)   int class indices
    Returns a scalar f32 loss (mean over rows).
    """
    n, c = x.shape
    confidence = 1.0 - smoothing

    itemsize = jnp.dtype(x.dtype).itemsize
    sub = max(8, 32 // itemsize)           # sublane multiple: 8 f32, 16 bf16/fp16

    # Biggest row tile whose logits block fits the per-buffer VMEM budget
    # (double-buffered by the pipeline), but never taller than the problem.
    rows_fit = max(sub, (block_budget_bytes // max(1, c * itemsize)) // sub * sub)
    tm = min(rows_fit, _round_up(n, sub))
    grid = pl.cdiv(n, tm)                  # no wrapper-side padding of x / target

    t_i32 = target.astype(jnp.int32).reshape(n, 1)
    n_arr = jnp.array([n], dtype=jnp.int32)

    # Scoped VMEM: double-buffered logits + targets + output slabs, plus headroom.
    vmem_need = 2 * tm * c * itemsize + 2 * tm * 4 + 2 * 8 * 128 * 4
    vmem_limit = int(min(max(vmem_need + (4 << 20), 32 << 20), 48 << 20))

    kernel = functools.partial(_label_smoothing_kernel,
                               confidence=confidence, smoothing=smoothing)

    out = pl.pallas_call(
        kernel,
        out_shape=jax.ShapeDtypeStruct((grid, 8, 128), jnp.float32),
        grid_spec=pltpu.PrefetchScalarGridSpec(
            num_scalar_prefetch=1,                       # n_valid -> SMEM
            grid=(grid,),
            in_specs=[
                pl.BlockSpec((tm, c), lambda i, n_ref: (i, 0)),   # logits block
                pl.BlockSpec((tm, 1), lambda i, n_ref: (i, 0)),   # targets block
            ],
            out_specs=pl.BlockSpec((1, 8, 128), lambda i, n_ref: (i, 0, 0)),
        ),
        compiler_params=pltpu.CompilerParams(
            dimension_semantics=("parallel",),           # independent row blocks
            vmem_limit_bytes=vmem_limit,
        ),
    )(n_arr, x, t_i32)

    # Final mean from per-block partial sums (kept in the wrapper so the row
    # axis stays fully parallel across TensorCores).
    return jnp.sum(out[:, 0, 0]) / jnp.float32(n)


def label_smoothing_reference(x, target, smoothing=0.0):
    """Plain-JAX reference of the same forward pass (for verification)."""
    confidence = 1.0 - smoothing
    logprobs = jax.nn.log_softmax(x.astype(jnp.float32), axis=-1)
    nll = -jnp.take_along_axis(logprobs, target[:, None].astype(jnp.int32),
                               axis=-1)[:, 0]
    smooth = -jnp.mean(logprobs, axis=-1)
    return jnp.mean(confidence * nll + smoothing * smooth)


if __name__ == "__main__":
    N, C = 64, 32
    smoothing = 0.1

    key = jax.random.PRNGKey(0)
    kx, kt = jax.random.split(key)
    x = jax.random.normal(kx, (N, C), dtype=jnp.float32)
    target = jax.random.randint(kt, (N,), 0, C, dtype=jnp.int32)

    # 1) Default budget -> whole problem in one block (grid=1), small-C fast path.
    out = jax.block_until_ready(label_smoothing_forward(x, target, smoothing))
    ref = jax.block_until_ready(label_smoothing_reference(x, target, smoothing))
    assert out.shape == (), out.shape
    assert jnp.allclose(out, ref, rtol=1e-5, atol=1e-5), (float(out), float(ref))

    # 2) Tiny budget + N not a multiple of tm -> grid=4 with a ragged last block,
    #    exercising the parallel per-block partial-sum path and the row mask.
    out2 = jax.block_until_ready(
        label_smoothing_forward(x[:50], target[:50], smoothing,
                                block_budget_bytes=16 * C * 4))
    ref2 = jax.block_until_ready(
        label_smoothing_reference(x[:50], target[:50], smoothing))
    assert jnp.allclose(out2, ref2, rtol=1e-5, atol=1e-5), (float(out2), float(ref2))

    # 3) bf16 logits stay bf16 end-to-end (no wrapper upcast); kernel computes in f32.
    x_bf16 = x.astype(jnp.bfloat16)
    out3 = jax.block_until_ready(label_smoothing_forward(x_bf16, target, smoothing))
    ref3 = jax.block_until_ready(label_smoothing_reference(x_bf16, target, smoothing))
    assert jnp.allclose(out3, ref3, rtol=1e-4, atol=1e-4), (float(out3), float(ref3))

    # 4) smoothing == 0.0 specialization (pure NLL, mean-reduction branch dropped).
    out4 = jax.block_until_ready(label_smoothing_forward(x, target, 0.0))
    ref4 = jax.block_until_ready(label_smoothing_reference(x, target, 0.0))
    assert jnp.allclose(out4, ref4, rtol=1e-5, atol=1e-5), (float(out4), float(ref4))

    print("KERNEL_OK")
</pallas_src>

<mosaic_0001>
module attributes {stable_mosaic.version = 11 : i64} {
  func.func @_label_smoothing_kernel(%arg0: i32, %arg1: memref<1xi32, #tpu.memory_space<smem>>, %arg2: memref<64x32xf32, #tpu.memory_space<vmem>>, %arg3: memref<64x1xi32, #tpu.memory_space<vmem>>, %arg4: memref<1x8x128xf32, #tpu.memory_space<vmem>>) attributes {dimension_semantics = [#tpu.dimension_semantics<parallel>], iteration_bounds = array<i64: 1>, scalar_prefetch = 1 : i64, scratch_operands = 0 : i64, tpu.core_type = #tpu.core_type<tc>, window_params = [{transform_indices = @transform_0, window_bounds = array<i64: 64, 32>}, {transform_indices = @transform_1, window_bounds = array<i64: 64, 1>}, {transform_indices = @transform_2, window_bounds = array<i64: 1, 8, 128>}]} {
    %c0 = arith.constant 0 : index
    %c0_0 = arith.constant 0 : index
    %0 = vector.load %arg2[%c0, %c0_0] : memref<64x32xf32, #tpu.memory_space<vmem>>, vector<64x32xf32>
    %cst = arith.constant dense<0xFF800000> : vector<64xf32>
    %1 = vector.multi_reduction <maximumf>, %0, %cst [1] : vector<64x32xf32> to vector<64xf32>
    %2 = vector.shape_cast %1 : vector<64xf32> to vector<64x1xf32>
    %3 = vector.broadcast %2 : vector<64x1xf32> to vector<64x32xf32>
    %4 = arith.subf %0, %3 : vector<64x32xf32>
    %5 = math.exp %4 : vector<64x32xf32>
    %cst_1 = arith.constant dense<0.000000e+00> : vector<64xf32>
    %6 = vector.multi_reduction <add>, %5, %cst_1 [1] : vector<64x32xf32> to vector<64xf32>
    %7 = vector.shape_cast %6 : vector<64xf32> to vector<64x1xf32>
    %8 = math.log %7 : vector<64x1xf32>
    %9 = tpu.iota {dimensions = array<i32: 1>} : vector<64x32xi32>
    %c0_2 = arith.constant 0 : index
    %c0_3 = arith.constant 0 : index
    %10 = vector.load %arg3[%c0_2, %c0_3] : memref<64x1xi32, #tpu.memory_space<vmem>>, vector<64x1xi32>
    %11 = vector.broadcast %10 : vector<64x1xi32> to vector<64x32xi32>
    %12 = arith.cmpi eq, %9, %11 : vector<64x32xi32>
    %cst_4 = arith.constant 0.000000e+00 : f32
    %13 = vector.broadcast %cst_4 : f32 to vector<64x32xf32>
    %14 = arith.select %12, %4, %13 : vector<64x32xi1>, vector<64x32xf32>
    %cst_5 = arith.constant dense<0.000000e+00> : vector<64xf32>
    %15 = vector.multi_reduction <add>, %14, %cst_5 [1] : vector<64x32xf32> to vector<64xf32>
    %16 = vector.shape_cast %15 : vector<64xf32> to vector<64x1xf32>
    %17 = arith.subf %8, %16 : vector<64x1xf32>
    %cst_6 = arith.constant dense<0.000000e+00> : vector<64xf32>
    %18 = vector.multi_reduction <add>, %4, %cst_6 [1] : vector<64x32xf32> to vector<64xf32>
    %19 = vector.shape_cast %18 : vector<64xf32> to vector<64x1xf32>
    %cst_7 = arith.constant 3.200000e+01 : f32
    %20 = vector.broadcast %cst_7 : f32 to vector<64x1xf32>
    %21 = arith.divf %19, %20 : vector<64x1xf32>
    %22 = arith.subf %8, %21 : vector<64x1xf32>
    %cst_8 = arith.constant 0.899999976 : f32
    %23 = vector.broadcast %cst_8 : f32 to vector<64x1xf32>
    %24 = arith.mulf %23, %17 : vector<64x1xf32>
    %cst_9 = arith.constant 1.000000e-01 : f32
    %25 = vector.broadcast %cst_9 : f32 to vector<64x1xf32>
    %26 = arith.mulf %25, %22 : vector<64x1xf32>
    %27 = arith.addf %24, %26 : vector<64x1xf32>
    %c0_10 = arith.constant 0 : index
    %28 = memref.load %arg1[%c0_10] : memref<1xi32, #tpu.memory_space<smem>>
    %c64_i32 = arith.constant 64 : i32
    %29 = arith.muli %arg0, %c64_i32 : i32
    %30 = tpu.iota {dimensions = array<i32: 0>} : vector<64x1xi32>
    %31 = vector.broadcast %29 : i32 to vector<64x1xi32>
    %32 = arith.addi %31, %30 : vector<64x1xi32>
    %33 = vector.broadcast %28 : i32 to vector<64x1xi32>
    %34 = arith.cmpi slt, %32, %33 : vector<64x1xi32>
    %cst_11 = arith.constant 0.000000e+00 : f32
    %35 = vector.broadcast %cst_11 : f32 to vector<64x1xf32>
    %36 = arith.select %34, %27, %35 : vector<64x1xi1>, vector<64x1xf32>
    %37 = vector.shape_cast %36 : vector<64x1xf32> to vector<1x64x1xf32>
    %cst_12 = arith.constant dense<0.000000e+00> : vector<1xf32>
    %38 = vector.multi_reduction <add>, %37, %cst_12 [1, 2] : vector<1x64x1xf32> to vector<1xf32>
    %39 = vector.shape_cast %38 : vector<1xf32> to vector<1x1x1xf32>
    %40 = vector.extract %39[0, 0, 0] : f32 from vector<1x1x1xf32>
    %41 = vector.broadcast %40 : f32 to vector<1x8x128xf32>
    %c0_13 = arith.constant 0 : index
    %c0_14 = arith.constant 0 : index
    %c0_15 = arith.constant 0 : index
    %42 = vector.load %arg4[%c0_13, %c0_14, %c0_15] : memref<1x8x128xf32, #tpu.memory_space<vmem>>, vector<1x8x128xf32>
    tpu.vector_store %arg4[%c0_13, %c0_14, %c0_15], %41 {strides = array<i32>} : memref<1x8x128xf32, #tpu.memory_space<vmem>>, vector<1x8x128xf32>,
    return
  }
  func.func @transform_0(%arg0: i32, %arg1: memref<1xi32, #tpu.memory_space<smem>>) -> (i32, i32) {
    %c0_i32 = arith.constant 0 : i32
    %c0_i32_0 = arith.constant 0 : i32
    return %arg0, %c0_i32 : i32, i32
  }
  func.func @transform_1(%arg0: i32, %arg1: memref<1xi32, #tpu.memory_space<smem>>) -> (i32, i32) {
    %c0_i32 = arith.constant 0 : i32
    %c0_i32_0 = arith.constant 0 : i32
    return %arg0, %c0_i32 : i32, i32
  }
  func.func @transform_2(%arg0: i32, %arg1: memref<1xi32, #tpu.memory_space<smem>>) -> (i32, i32, i32) {
    %c0_i32 = arith.constant 0 : i32
    %c0_i32_0 = arith.constant 0 : i32
    %c0_i32_1 = arith.constant 0 : i32
    return %arg0, %c0_i32, %c0_i32_0 : i32, i32, i32
  }
}

</mosaic_0001>

<bundles_post_ra>
// kernel: tpu_custom_call.1
= control target key start
LH: loop header
LB: loop body
LE: loop exit
PB: predicated region body
PF: predicated region fallthrough
CT: control target
= control target key end

     0   :  { %vm22_vm0 = vcmask 261120   ;;  %v398_v6 = vmov 0   ;;  %s602_s0 = inlined_call_operand.<no memory space> [shape: s32[1], index: 0, kind: input, shape index: {}]   ;;  %s603_s1 = inlined_call_operand.vmem [shape: f32[64,32], index: 1, kind: input, shape index: {}]   ;;  %s604_s2 = inlined_call_operand.vmem [shape: s32[64,1], index: 2, kind: input, shape index: {}]   ;;  %s605_s3 = inlined_call_operand.hbm [shape: f32[1,8,128], index: 3, kind: output, shape index: {}]  }
   0x1   :  { %v16_v0 = vld [vmem:[%s603_s1 + $0x10] sm:$0xff]  ;;  %v14_v1 = vld [vmem:[%s603_s1] sm:$0xff]  ;;  %v17_v2 = vld [vmem:[%s603_s1 + $0x18] sm:$0xff]  ;;  %341 = vset.pattern.permute.xlu1 %v398_v6  ;;  %340 = vset.pattern.permute.xlu0 %v398_v6 }
   0x2   :  { %v29_v3 = vsel %vm22_vm0, %v16_v0, -inf  ;;  %v23_v4 = vsel %vm22_vm0, %v14_v1, -inf  ;;  %v15_v5 = vld [vmem:[%s603_s1 + $0x8] sm:$0xff]  ;;  %v32_v7 = vsel %vm22_vm0, %v17_v2, -inf  ;;  %v18_v10 = vld [vmem:[%s603_s1 + $0x20] sm:$0xff] }
   0x3   :  { %30 = vmax.xlane.f32.xlu1 %v29_v3  ;;  %24 = vmax.xlane.f32.xlu0 %v23_v4  ;;  %v26_v8 = vsel %vm22_vm0, %v15_v5, -inf  ;;  %v19_v9 = vld [vmem:[%s603_s1 + $0x28] sm:$0xff] }
   0x4   :  { %9 = vsyncpa [#allocation5], 0  ;;  %v38_v11 = vsel %vm22_vm0, %v19_v9, -inf  ;;  %v35_v12 = vsel %vm22_vm0, %v18_v10, -inf  ;;  %v447_v13 = vld [vmem:[%s603_s1 + $0x38] sm:$0xff]  ;;  %v20_v14 = vld [vmem:[%s603_s1 + $0x30] sm:$0xff]  ;;  %v111_v36 = vlaneseq }
   0x5   :  { %v44_v15 = vsel %vm22_vm0, %v447_v13, -inf  ;;  %v41_v16 = vsel %vm22_vm0, %v20_v14, -inf  ;;  %v114_v17 = vld [vmem:[%s604_s2 + $0x8] sm:$0xff]  ;;  %v115_v18 = vld [vmem:[%s604_s2 + $0x10] sm:$0xff]  ;;  %v113_v19 = vld [vmem:[%s604_s2] sm:$0xff]  ;;  %vm295_vm9 = vcmask 7168  }
   0x6   :  { %v116_v20 = vld [vmem:[%s604_s2 + $0x18] sm:$0xff]  ;;  %v117_v21 = vld [vmem:[%s604_s2 + $0x20] sm:$0xff]  ;;  %v118_v22 = vld [vmem:[%s604_s2 + $0x28] sm:$0xff]  ;;  %v483_v42 = vand.u32 127, %v111_v36 }
   0x7   :  { %33 = vmax.xlane.f32.xlu1 %v32_v7  ;;  %27 = vmax.xlane.f32.xlu0 %v26_v8  ;;  %v119_v23 = vld [vmem:[%s604_s2 + $0x30] sm:$0xff]  ;;  %v120_v24 = vld [vmem:[%s604_s2 + $0x38] sm:$0xff] }
   0xb   :  { %39 = vmax.xlane.f32.xlu1 %v38_v11  ;;  %36 = vmax.xlane.f32.xlu0 %v35_v12 }
   0xf   :  { %45 = vmax.xlane.f32.xlu1 %v44_v15  ;;  %42 = vmax.xlane.f32.xlu0 %v41_v16 }
  0x20   :  { %125 = vperm.xlu1 %341, %v114_v17  }
  0x24   :  { %128 = vperm.xlu1 %341, %v115_v18  }
  0x25   :  { %122 = vperm.xlu0 %340, %v113_v19  }
  0x28   :  { %131 = vperm.xlu1 %341, %v116_v20  }
  0x2c   :  { %134 = vperm.xlu1 %341, %v117_v21  }
  0x30   :  { %137 = vperm.xlu1 %341, %v118_v22  }
  0x34   :  { %140 = vperm.xlu1 %341, %v119_v23  }
  0x38   :  { %143 = vperm.xlu1 %341, %v120_v24  }
  0x90   :  { %v31_v25 = vpop.xlane.xlu1 %30  ;;  %v25_v26 = vpop.xlane.xlu0 %24 }
  0x91   :  { %v47_v27 = vsub.f32 %v14_v1, %v25_v26  ;;  %v49_v32 = vsub.f32 %v16_v0, %v31_v25 }
  0x93   :  { %v193_v28 = vsel %vm22_vm0, %v47_v27, 0.0  ;;  %v199_v39 = vsel %vm22_vm0, %v49_v32, 0.0  ;;  %v59_v41 = vmul.f32 1.442695, %v49_v32  ;;  %v55_v43 = vmul.f32 1.442695, %v47_v27 }
  0x94   :  { %v34_v29 = vpop.xlane.xlu1 %33  ;;  %v28_v30 = vpop.xlane.xlu0 %27  ;;  %194 = vadd.xlane.f32.xlu1 %v193_v28 }
  0x95   :  { %v48_v31 = vsub.f32 %v15_v5, %v28_v30  ;;  %v50_v38 = vsub.f32 %v17_v2, %v34_v29 }
  0x97   :  { %v196_v33 = vsel %vm22_vm0, %v48_v31, 0.0  ;;  %v57_v37 = vmul.f32 1.442695, %v48_v31  ;;  %v202_v46 = vsel %vm22_vm0, %v50_v38, 0.0  ;;  %v61_v47 = vmul.f32 1.442695, %v50_v38 }
  0x98   :  { %v40_v34 = vpop.xlane.xlu1 %39  ;;  %197 = vadd.xlane.f32.xlu0 %v196_v33  ;;  %v37_v35 = vpop.xlane.xlu0 %36 }
  0x99   :  { %342 = vpow2.f32 %v57_v37  ;;  %v485_v44 = vsub.f32 %v18_v10, %v37_v35  ;;  %v488_v49 = vsub.f32 %v19_v9, %v40_v34 }
  0x9a   :  { %344 = vpow2.f32 %v59_v41 }
  0x9b   :  { %346 = vpow2.f32 %v55_v43  ;;  %v63_v50 = vmul.f32 1.442695, %v485_v44  ;;  %v65_v56 = vmul.f32 1.442695, %v488_v49  ;;  %v205_v21 = vsel %vm22_vm0, %v485_v44, 0.0 }
  0x9c   :  { %v46_v40 = vpop.xlane.xlu1 %45  ;;  %200 = vadd.xlane.f32.xlu0 %v199_v39  ;;  %v43_v45 = vpop.xlane.xlu0 %42  ;;  %348 = vpow2.f32 %v61_v47  ;;  %v208_v25 = vsel %vm22_vm0, %v488_v49, 0.0 }
  0x9d   :  { %v492_v51 = vsub.f32 %v20_v14, %v43_v45  ;;  %v497_v57 = vsub.f32 %v447_v13, %v46_v40  ;;  %350 = vpow2.f32 %v63_v50 }
  0x9e   :  { %352 = vpow2.f32 %v65_v56  ;;  %v544_v56 = vstv %s602_s0  ;;  %s399_s0 = smov [#allocation4]  }
  0x9f   :  { %v67_v58 = vmul.f32 1.442695, %v492_v51  ;;  %v69_v1 = vmul.f32 1.442695, %v497_v57  ;;  %v211_v29 = vsel %vm22_vm0, %v492_v51, 0.0  ;;  %s328_s17 = sshll.u32 %s399_s0, 4  ;;  %s329_s17 = int_to_ptr.vmem [resolvable:$true] %s328_s17 }
  0xa0   :  { %v126_v48 = vpop.permute.xlu1 %125  ;;  %203 = vadd.xlane.f32.xlu0 %v202_v46  ;;  %s374_s19 = scalar_lea.vmem %s329_s17, 128  ;;  %p379_p1 = scmp.lt.s32.totalorder %s329_s17, %s329_s17 }
  0xa1   :  { %vm146_vm1 = vcmp.eq.s32.totalorder %v483_v42, %v126_v48  ;;  %354 = vpow2.f32 %v67_v58  ;;  %p375_p0 = scmp.ne.s32.totalorder %s329_s17, %s374_s19  ;;  %p380_p2 = scmp.lt.s32.totalorder %s374_s19, %s374_s19 }
  0xa2   :  { %v154_v52 = vsel %vm146_vm1, %v48_v31, 0.0  ;;  %356 = vpow2.f32 %v69_v1 }
  0xa3   :  { %v164_v53 = vsel %vm22_vm0, %v154_v52, 0.0  ;;  %v343_v63 = vpop.eup %342  ;;  %p381_p3 = por %p380_p2, %p379_p1 }
  0xa4   :  { %v129_v54 = vpop.permute.xlu1 %128  ;;  %165 = vadd.xlane.f32.xlu1 %v164_v53  ;;  %v123_v55 = vpop.permute.xlu0 %122  ;;  %v74_v5 = vsel %vm22_vm0, %v343_v63, 0.0 }
  0xa5   :  { %vm147_vm2 = vcmp.eq.s32.totalorder %v483_v42, %v129_v54  ;;  %vm145_vm3 = vcmp.eq.s32.totalorder %v483_v42, %v123_v55  ;;  %v345_v3 = vpop.eup %344  ;;  %p382_p4 = pnand %p381_p3, %p375_p0 }
  0xa6   :  { %v155_v59 = vsel %vm147_vm2, %v49_v32, 0.0  ;;  %v153_v60 = vsel %vm145_vm3, %v47_v27, 0.0  ;;  %v347_v6 = vpop.eup %346  ;;  %v77_v9 = vsel %vm22_vm0, %v345_v3, 0.0  ;;  %v214_v32 = vsel %vm22_vm0, %v497_v57, 0.0 }
  0xa7   :  { %v167_v61 = vsel %vm22_vm0, %v155_v59, 0.0  ;;  %v161_v62 = vsel %vm22_vm0, %v153_v60, 0.0  ;;  %v349_v7 = vpop.eup %348  ;;  %v71_v8 = vsel %vm22_vm0, %v347_v6, 0.0 }
  0xa8   :  { %v132_v0 = vpop.permute.xlu1 %131  ;;  %168 = vadd.xlane.f32.xlu1 %v167_v61  ;;  %162 = vadd.xlane.f32.xlu0 %v161_v62  ;;  %v351_v10 = vpop.eup %350  ;;  %v80_v13 = vsel %vm22_vm0, %v349_v7, 0.0 }
  0xa9   :  { %vm148_vm4 = vcmp.eq.s32.totalorder %v483_v42, %v132_v0  ;;  %v353_v12 = vpop.eup %352  ;;  %v83_v14 = vsel %vm22_vm0, %v351_v10, 0.0 }
  0xaa   :  { %v156_v2 = vsel %vm148_vm4, %v50_v38, 0.0  ;;  %v86_v17 = vsel %vm22_vm0, %v353_v12, 0.0 }
  0xab   :  { %v170_v4 = vsel %vm22_vm0, %v156_v2, 0.0  ;;  %v355_v15 = vpop.eup %354 }
  0xac   :  { %171 = vadd.xlane.f32.xlu1 %v170_v4  ;;  %75 = vadd.xlane.f32.xlu0 %v74_v5  ;;  %v135_v11 = vpop.permute.xlu1 %134  ;;  %v89_v18 = vsel %vm22_vm0, %v355_v15, 0.0  ;;  %v357_v19 = vpop.eup %356 }
  0xad   :  { %vm149_vm5 = vcmp.eq.s32.totalorder %v483_v42, %v135_v11  ;;  %v92_v20 = vsel %vm22_vm0, %v357_v19, 0.0 }
  0xae   :  { %v157_v23 = vsel %vm149_vm5, %v485_v44, 0.0 }
  0xaf   :  { %v173_v24 = vsel %vm22_vm0, %v157_v23, 0.0 }
  0xb0   :  { %72 = vadd.xlane.f32.xlu1 %v71_v8  ;;  %78 = vadd.xlane.f32.xlu0 %v77_v9  ;;  %v138_v16 = vpop.permute.xlu1 %137 }
  0xb1   :  { %vm150_vm6 = vcmp.eq.s32.totalorder %v483_v42, %v138_v16 }
  0xb2   :  { %v158_v26 = vsel %vm150_vm6, %v488_v49, 0.0  ;;  %v538_v49 = vshrl.u32 %v111_v36, 7 }
  0xb3   :  { %v176_v28 = vsel %vm22_vm0, %v158_v26, 0.0 }
  0xb4   :  { %81 = vadd.xlane.f32.xlu1 %v80_v13  ;;  %84 = vadd.xlane.f32.xlu0 %v83_v14  ;;  %v141_v22 = vpop.permute.xlu1 %140  ;;  %v262_v55 = vadd.s32 8, %v538_v49  ;;  %v263_v60 = vadd.s32 16, %v538_v49  ;;  %v548_v61 = vadd.s32 24, %v538_v49  ;;  %v552_v9 = vadd.s32 32, %v538_v49 }
  0xb5   :  { %vm151_vm7 = vcmp.eq.s32.totalorder %v483_v42, %v141_v22  ;;  %vm279_vm11 = vcmp.lt.s32.totalorder %v538_v49, %v544_v56  ;;  %v561_v22 = vadd.s32 48, %v538_v49 }
  0xb6   :  { %v159_v30 = vsel %vm151_vm7, %v492_v51, 0.0  ;;  %vm280_vm10 = vcmp.lt.s32.totalorder %v262_v55, %v544_v56  ;;  %vm281_vm12 = vcmp.lt.s32.totalorder %v263_v60, %v544_v56  ;;  %vm282_vm13 = vcmp.lt.s32.totalorder %v548_v61, %v544_v56 }
  0xb7   :  { %v179_v31 = vsel %vm22_vm0, %v159_v30, 0.0  ;;  %vm283_vm14 = vcmp.lt.s32.totalorder %v552_v9, %v544_v56 }
  0xb8   :  { %87 = vadd.xlane.f32.xlu1 %v86_v17  ;;  %90 = vadd.xlane.f32.xlu0 %v89_v18  ;;  %v144_v27 = vpop.permute.xlu1 %143 }
  0xb9   :  { %vm152_vm8 = vcmp.eq.s32.totalorder %v483_v42, %v144_v27 }
  0xba   :  { %v160_v33 = vsel %vm152_vm8, %v497_v57, 0.0 }
  0xbb   :  { %v182_v34 = vsel %vm22_vm0, %v160_v33, 0.0  ;;  %vm285_vm0 = vcmp.lt.s32.totalorder %v561_v22, %v544_v56 }
  0xbc   :  { %93 = vadd.xlane.f32.xlu1 %v92_v20  ;;  %206 = vadd.xlane.f32.xlu0 %v205_v21  ;;  %v266_v21 = vadd.s32 40, %v538_v49 }
  0xbe   :  { %vm284_vm15 = vcmp.lt.s32.totalorder %v266_v21, %v544_v56 }
  0xc0   :  { %174 = vadd.xlane.f32.xlu1 %v173_v24  ;;  %209 = vadd.xlane.f32.xlu0 %v208_v25 }
  0xc4   :  { %177 = vadd.xlane.f32.xlu1 %v176_v28  ;;  %212 = vadd.xlane.f32.xlu0 %v211_v29 }
  0xc8   :  { %180 = vadd.xlane.f32.xlu1 %v179_v31  ;;  %215 = vadd.xlane.f32.xlu0 %v214_v32 }
  0xcc   :  { %183 = vadd.xlane.f32.xlu1 %v182_v34 }
 0x121   :  { %v195_v38 = vpop.xlane.xlu1 %194 }
 0x122   :  { %v218_v59 = vmul.f32 0.03125, %v195_v38 }
 0x125   :  { %v198_v35 = vpop.xlane.xlu0 %197 }
 0x126   :  { %v219_v51 = vmul.f32 0.03125, %v198_v35 }
 0x129   :  { %v201_v37 = vpop.xlane.xlu0 %200 }
 0x12a   :  { %v220_v4 = vmul.f32 0.03125, %v201_v37 }
 0x12d   :  { %v204_v39 = vpop.xlane.xlu0 %203 }
 0x12e   :  { %v221_v23 = vmul.f32 0.03125, %v204_v39 }
 0x131   :  { %v166_v40 = vpop.xlane.xlu1 %165 }
 0x135   :  { %v169_v41 = vpop.xlane.xlu1 %168  ;;  %v163_v43 = vpop.xlane.xlu0 %162 }
 0x139   :  { %v535_v42 = vpop.xlane.xlu1 %171  ;;  %v76_v44 = vpop.xlane.xlu0 %75 }
 0x13a   :  { %358 = vlog2.f32 %v76_v44 }
 0x13d   :  { %v73_v45 = vpop.xlane.xlu1 %72  ;;  %v79_v46 = vpop.xlane.xlu0 %78 }
 0x13e   :  { %360 = vlog2.f32 %v73_v45 }
 0x13f   :  { %362 = vlog2.f32 %v79_v46 }
 0x141   :  { %v82_v47 = vpop.xlane.xlu1 %81  ;;  %v85_v48 = vpop.xlane.xlu0 %84 }
 0x142   :  { %364 = vlog2.f32 %v82_v47 }
 0x143   :  { %366 = vlog2.f32 %v85_v48 }
 0x144   :  { %v359_v50 = vpop.eup %358 }
 0x145   :  { %v98_v52 = vmul.f32 0.6931472, %v359_v50  ;;  %v88_v53 = vpop.xlane.xlu1 %87  ;;  %v91_v54 = vpop.xlane.xlu0 %90 }
 0x146   :  { %368 = vlog2.f32 %v88_v53 }
 0x147   :  { %v186_v57 = vsub.f32 %v98_v52, %v166_v40  ;;  %v227_v58 = vsub.f32 %v98_v52, %v219_v51  ;;  %370 = vlog2.f32 %v91_v54 }
 0x148   :  { %v361_v36 = vpop.eup %360 }
 0x149   :  { %v363_v62 = vpop.eup %362  ;;  %v235_v63 = vmul.f32 0.9, %v186_v57  ;;  %v243_v0 = vmul.f32 0.1, %v227_v58  ;;  %v96_v1 = vmul.f32 0.6931472, %v361_v36  ;;  %v94_v2 = vpop.xlane.xlu1 %93 }
 0x14a   :  { %v207_v3 = vpop.xlane.xlu0 %206  ;;  %v100_v5 = vmul.f32 0.6931472, %v363_v62  ;;  %372 = vlog2.f32 %v94_v2 }
 0x14b   :  { %v251_v6 = vadd.f32 %v243_v0, %v235_v63  ;;  %v185_v7 = vsub.f32 %v96_v1, %v163_v43  ;;  %v226_v8 = vsub.f32 %v96_v1, %v218_v59  ;;  %v222_v30 = vmul.f32 0.03125, %v207_v3 }
 0x14c   :  { %v365_v10 = vpop.eup %364  ;;  %v187_v11 = vsub.f32 %v100_v5, %v169_v41  ;;  %v228_v12 = vsub.f32 %v100_v5, %v220_v4 }
 0x14d   :  { %v367_v13 = vpop.eup %366  ;;  %v288_v14 = vsel %vm280_vm10, %v251_v6, 0.0  ;;  %v234_v15 = vmul.f32 0.9, %v185_v7  ;;  %v242_v16 = vmul.f32 0.1, %v226_v8  ;;  %v175_v17 = vpop.xlane.xlu1 %174 }
 0x14e   :  { %v210_v18 = vpop.xlane.xlu0 %209  ;;  %v236_v19 = vmul.f32 0.9, %v187_v11  ;;  %v244_v20 = vmul.f32 0.1, %v228_v12  ;;  %v102_v25 = vmul.f32 0.6931472, %v365_v10 }
 0x14f   :  { %v250_v24 = vadd.f32 %v242_v16, %v234_v15  ;;  %v104_v26 = vmul.f32 0.6931472, %v367_v13  ;;  %v297_v28 = vsel %vm295_vm9, %v288_v14, 0.0  ;;  %v223_v31 = vmul.f32 0.03125, %v210_v18 }
 0x150   :  { %v369_v27 = vpop.eup %368  ;;  %v252_v29 = vadd.f32 %v244_v20, %v236_v19  ;;  %v188_v34 = vsub.f32 %v102_v25, %v535_v42  ;;  %v229_v35 = vsub.f32 %v102_v25, %v221_v23  ;;  %v268_v13 = vadd.s32 56, %v538_v49 }
 0x151   :  { %v371_v32 = vpop.eup %370  ;;  %v287_v33 = vsel %vm279_vm11, %v250_v24, 0.0  ;;  %v106_v37 = vmul.f32 0.6931472, %v369_v27  ;;  %v178_v38 = vpop.xlane.xlu1 %177  ;;  %v230_v44 = vsub.f32 %v104_v26, %v222_v30  ;;  %v189_v52 = vsub.f32 %v104_v26, %v175_v17 }
 0x152   :  { %v213_v39 = vpop.xlane.xlu0 %212  ;;  %v296_v40 = vsel %vm295_vm9, %v287_v33, 0.0  ;;  %v289_v41 = vsel %vm281_vm12, %v252_v29, 0.0  ;;  %v108_v43 = vmul.f32 0.6931472, %v371_v32  ;;  %v237_v47 = vmul.f32 0.9, %v188_v34 }
 0x153   :  { %v298_v45 = vadd.f32 %v297_v28, %v296_v40  ;;  %v299_v46 = vsel %vm295_vm9, %v289_v41, 0.0  ;;  %v245_v48 = vmul.f32 0.1, %v229_v35  ;;  %v246_v51 = vmul.f32 0.1, %v230_v44 }
 0x154   :  { %v373_v50 = vpop.eup %372  ;;  %v231_v42 = vsub.f32 %v106_v37, %v223_v31  ;;  %v190_v53 = vsub.f32 %v106_v37, %v178_v38  ;;  %v224_v58 = vmul.f32 0.03125, %v213_v39  ;;  %v238_v60 = vmul.f32 0.9, %v189_v52 }
 0x155   :  { %v253_v54 = vadd.f32 %v245_v48, %v237_v47  ;;  %v110_v55 = vmul.f32 0.6931472, %v373_v50  ;;  %v300_v57 = vadd.f32 %v299_v46, %v298_v45  ;;  %v181_v36 = vpop.xlane.xlu1 %180  ;;  %vm286_vm1 = vcmp.lt.s32.totalorder %v268_v13, %v544_v56 }
 0x156   :  { %v216_v59 = vpop.xlane.xlu0 %215  ;;  %v247_v62 = vmul.f32 0.1, %v231_v42  ;;  %v239_v63 = vmul.f32 0.9, %v190_v53  ;;  %v191_v0 = vsub.f32 %v108_v43, %v181_v36  ;;  %v232_v2 = vsub.f32 %v108_v43, %v224_v58 }
 0x157   :  { %v290_v1 = vsel %vm282_vm13, %v253_v54, 0.0  ;;  %v225_v3 = vmul.f32 0.03125, %v216_v59  ;;  %v254_v4 = vadd.f32 %v246_v51, %v238_v60 }
 0x158   :  { %v301_v5 = vsel %vm295_vm9, %v290_v1, 0.0  ;;  %v255_v6 = vadd.f32 %v247_v62, %v239_v63  ;;  %v240_v7 = vmul.f32 0.9, %v191_v0  ;;  %v248_v10 = vmul.f32 0.1, %v232_v2 }
 0x159   :  { %v302_v8 = vadd.f32 %v301_v5, %v300_v57  ;;  %v233_v11 = vsub.f32 %v110_v55, %v225_v3  ;;  %v184_v12 = vpop.xlane.xlu1 %183  ;;  %v291_v61 = vsel %vm283_vm14, %v254_v4, 0.0 }
 0x15a   :  { %v292_v14 = vsel %vm284_vm15, %v255_v6, 0.0  ;;  %v192_v15 = vsub.f32 %v110_v55, %v184_v12  ;;  %v303_v16 = vsel %vm295_vm9, %v291_v61, 0.0  ;;  %v256_v18 = vadd.f32 %v248_v10, %v240_v7 }
 0x15b   :  { %v305_v17 = vsel %vm295_vm9, %v292_v14, 0.0  ;;  %v304_v19 = vadd.f32 %v303_v16, %v302_v8  ;;  %v249_v20 = vmul.f32 0.1, %v233_v11 }
 0x15c   :  { %v241_v21 = vmul.f32 0.9, %v192_v15  ;;  %v293_v23 = vsel %vm285_vm0, %v256_v18, 0.0 }
 0x15d   :  { %v306_v24 = vadd.f32 %v305_v17, %v304_v19  ;;  %v307_v9 = vsel %vm295_vm9, %v293_v23, 0.0 }
 0x15e   :  { %v257_v49 = vadd.f32 %v249_v20, %v241_v21 }
 0x15f   :  { %v308_v26 = vadd.f32 %v307_v9, %v306_v24 }
 0x160   :  { %v294_v25 = vsel %vm286_vm1, %v257_v49, 0.0 }
 0x161   :  { %v309_v22 = vsel %vm295_vm9, %v294_v25, 0.0 }
 0x162   :  { %v310_v27 = vadd.f32 %v309_v22, %v308_v26 }
 0x164   :  { %311 = vadd.xlane.f32.xlu0 %v310_v27 }
 0x1f1   :  { %v312_v28 = vpop.xlane.xlu0 %311 }
 0x1f2   :  { %v313_v29 = vrot.slane %v312_v28, 4 }
 0x1f4   :  { %v314_v30 = vadd.f32 %v313_v29, %v312_v28 }
 0x1f6   :  { %v315_v31 = vrot.slane %v314_v30, 2 }
 0x1f8   :  { %v316_v32 = vadd.f32 %v315_v31, %v314_v30 }
 0x1fa   :  { %v317_v33 = vrot.slane %v316_v32, 1 }
 0x1fc   :  { %v318_v34 = vadd.f32 %v317_v33, %v316_v32 }
 0x1fe   :  { %336 = vpush %v318_v34 }
 0x22f   :  { %s337_s18 = spop %336 }
 0x230   :  { %v320_v56 = vstv %s337_s18 }
 0x231   :  { %321 = vst [vmem:[#allocation4] sm:$0xff] %v320_v56 }
 0x232   :  { %385 = shalt.err (!%p382_p4)
}
 0x233   :  { %s386_s22 = scalar_lea.hbm %s605_s3, 128 }
 0x234   :  { %p387_p5 = scmp.ne.s32.totalorder %s605_s3, %s386_s22  ;;  %p390_p6 = scmp.lt.u32.totalorder %s386_s22, %s605_s3 }
 0x236   :  { %p392_p7 = pnand %p390_p6, %p387_p5 }
 0x238   :  { %395 = shalt.err (!%p392_p7)
}
 0x239   :  { %331 = dma.vmem_to_hbm [thread:$0]  %s329_s17, 128, %s605_s3, [#allocation5]  }
 0x23a   :  { %396 = dma.done.wait [#allocation5], 128  }
 0x23b   :  { %397 = vsyncadd [#allocation5], 4294967168 }
 0x23c   :  { %335 = vsyncpa [#allocation5], 1 }

</bundles_post_ra>
